<compile_context>
chip_gen: v7x
topology: tpu7x:2x2x1
jax: 0.10.0
libtpu: 0.0.40
codegen_flags: <defaults>
</compile_context>

<pallas_src>
import jax
import jax.numpy as jnp
from jax.experimental import pallas as pl
from jax.experimental.pallas import tpu as pltpu


def _ceil_to(x, m):
    return ((x + m - 1) // m) * m


def _cdiv(a, b):
    return (a + b - 1) // b


def _vmem_capacity_bytes(default=64 * 1024 * 1024):
    try:
        info = pltpu.get_tpu_info()
    except Exception:
        return default
    for name in ("vmem_capacity_bytes", "vmem_size_bytes", "vmem_bytes"):
        v = getattr(info, name, None)
        if isinstance(v, int) and v > 0:
            return v
    return default


# ----------------------------- Pallas kernels --------------------------------
def _adapter_kernel_resident(x_ref, res_ref, wd_ref, bd_ref, wu_ref, bu_ref, o_ref):
    """Both weights fully resident in VMEM: one fused pass per row tile."""
    h = jnp.dot(x_ref[...].astype(wd_ref.dtype), wd_ref[...],
                preferred_element_type=jnp.float32)
    g = jax.nn.gelu(h + bd_ref[...]).astype(wu_ref.dtype)
    up = jnp.dot(g, wu_ref[...], preferred_element_type=jnp.float32)
    o_ref[...] = (up + bu_ref[...] + res_ref[...].astype(jnp.float32)).astype(o_ref.dtype)


def _adapter_kernel_tiled(x_ref, res_ref, wd_ref, bd_ref, wu_ref, bu_ref, o_ref, h_ref):
    """Hidden dim tiled along grid axis 1; gelu(down-proj) cached in bf16 scratch."""
    @pl.when(pl.program_id(1) == 0)
    def _():
        h = jnp.dot(x_ref[...].astype(wd_ref.dtype), wd_ref[...],
                    preferred_element_type=jnp.float32)
        h_ref[...] = jax.nn.gelu(h + bd_ref[...]).astype(h_ref.dtype)

    up = jnp.dot(h_ref[...], wu_ref[...], preferred_element_type=jnp.float32)
    o_ref[...] = (up + bu_ref[...] + res_ref[...].astype(jnp.float32)).astype(o_ref.dtype)


# ------------------------------- wrapper --------------------------------------
def _adapter_forward(x, input_tensor, wd_p, bd_p, wu_p, bu_p, *,
                     tm=256, tn=256, allow_resident=True,
                     compute_dtype=jnp.bfloat16):
    """x, input_tensor: (B, S, H). Weights pre-padded/pre-cast (pack_adapter_params)."""
    B, S, H = x.shape
    Hp, Dp = wd_p.shape
    assert wu_p.shape == (Dp, Hp) and bd_p.shape == (1, Dp) and bu_p.shape == (1, Hp)
    assert Hp % 128 == 0 and Dp % 128 == 0 and Hp >= H
    rows = B * S
    out_dtype = x.dtype

    xsize = jnp.dtype(x.dtype).itemsize
    osize = jnp.dtype(out_dtype).itemsize
    csize = jnp.dtype(compute_dtype).itemsize

    vmem_cap = _vmem_capacity_bytes()
    budget = (vmem_cap * 85) // 100

    def vmem_need(tm_try, tn_try, resident):
        wd_b = Hp * Dp * csize + Dp * 4                      # Buffered(1) weights+bias
        wu_b = (1 if resident else 2) * (Dp * tn_try * csize + tn_try * 4)
        x_b = 2 * tm_try * Hp * xsize                        # double-buffered activations
        res_out_b = 4 * tm_try * tn_try * osize              # residual + output (x2 bufs)
        h_b = 0 if resident else tm_try * Dp * csize         # bf16 gelu scratch
        return wd_b + wu_b + x_b + res_out_b + h_b

    # Balanced row tiles, >=2 tiles when possible (v7x megacore), 16-aligned
    # for bf16 sublane packing.
    n_row_tiles = max(1, _cdiv(rows, tm))
    if rows >= 32:
        n_row_tiles = max(n_row_tiles, 2)
    tm_eff = _ceil_to(_cdiv(rows, n_row_tiles), 16)

    # Keep W_up fully resident (fetched once for the whole grid) whenever both
    # weights + activation tiles fit the VMEM budget; otherwise tile hidden dim.
    resident = allow_resident and vmem_need(min(tm_eff, 64), Hp, True) <= budget
    if resident:
        tn_eff = Hp
    else:
        tn_eff = 128
        c = (max(128, min(tn, Hp)) // 128) * 128
        while c >= 128:                       # largest 128-multiple dividing Hp
            if Hp % c == 0:
                tn_eff = c
                break
            c -= 128

    # Shrink the row tile until the working set fits.
    while tm_eff > 16 and vmem_need(tm_eff, tn_eff, resident) > budget:
        tm_eff -= 16

    rows_p = _ceil_to(rows, tm_eff)
    grid_i = rows_p // tm_eff

    # Flatten; zero-pad only when actually needed (padding is exact: padded
    # weight rows/cols and biases are zero, padded rows are sliced off).
    x2 = x.reshape(rows, H)
    r2 = input_tensor.reshape(rows, H).astype(out_dtype)
    if rows_p != rows or Hp != H:
        x2 = jnp.pad(x2, ((0, rows_p - rows), (0, Hp - H)))
        r2 = jnp.pad(r2, ((0, rows_p - rows), (0, Hp - H)))

    need = vmem_need(tm_eff, tn_eff, resident)
    vmem_limit = int(min(max(need * 5 // 4, 32 * 1024 * 1024), (vmem_cap * 9) // 10))

    wu_hbm_reads = (1 if resident else grid_i) * Hp * Dp * csize
    cost = pl.CostEstimate(
        flops=4 * rows_p * Hp * Dp,
        transcendentals=rows_p * Dp,
        bytes_accessed=rows_p * Hp * (xsize + 2 * osize)
        + Hp * Dp * csize + wu_hbm_reads + (Dp + Hp) * 4)

    buf1 = pl.Buffered(1)   # single-buffer operands whose block index never changes

    if resident:
        grid = (grid_i,)
        # Residual and output share the SAME spec object -> aliasing stays safe.
        ro_spec = pl.BlockSpec((tm_eff, Hp), lambda i: (i, 0))
        in_specs = [
            pl.BlockSpec((tm_eff, Hp), lambda i: (i, 0)),                      # x (cast in-kernel)
            ro_spec,                                                           # residual
            pl.BlockSpec((Hp, Dp), lambda i: (0, 0), pipeline_mode=buf1),      # W_down
            pl.BlockSpec((1, Dp), lambda i: (0, 0), pipeline_mode=buf1),       # b_down
            pl.BlockSpec((Dp, Hp), lambda i: (0, 0), pipeline_mode=buf1),      # W_up (resident)
            pl.BlockSpec((1, Hp), lambda i: (0, 0), pipeline_mode=buf1),       # b_up
        ]
        out_specs = ro_spec
        scratch_shapes = []
        kernel = _adapter_kernel_resident
        dim_sem = ("parallel",)
    else:
        grid = (grid_i, Hp // tn_eff)
        ro_spec = pl.BlockSpec((tm_eff, tn_eff), lambda i, j: (i, j))
        in_specs = [
            pl.BlockSpec((tm_eff, Hp), lambda i, j: (i, 0)),                   # x row tile
            ro_spec,                                                           # residual
            pl.BlockSpec((Hp, Dp), lambda i, j: (0, 0), pipeline_mode=buf1),   # W_down
            pl.BlockSpec((1, Dp), lambda i, j: (0, 0), pipeline_mode=buf1),    # b_down
            pl.BlockSpec((Dp, tn_eff), lambda i, j: (0, j)),                   # W_up tile (streamed)
            pl.BlockSpec((1, tn_eff), lambda i, j: (0, j)),                    # b_up tile
        ]
        out_specs = ro_spec
        scratch_shapes = [pltpu.VMEM((tm_eff, Dp), compute_dtype)]             # bf16 gelu scratch
        kernel = _adapter_kernel_tiled
        # Row axis parallel (megacore); hidden axis must stay innermost/serial
        # because the gelu scratch is carried across it.
        dim_sem = ("parallel", "arbitrary")

    out = pl.pallas_call(
        kernel,
        out_shape=jax.ShapeDtypeStruct((rows_p, Hp), out_dtype),
        grid_spec=pltpu.PrefetchScalarGridSpec(
            num_scalar_prefetch=0,
            grid=grid,
            in_specs=in_specs,
            out_specs=out_specs,
            scratch_shapes=scratch_shapes,
        ),
        compiler_params=pltpu.CompilerParams(
            dimension_semantics=dim_sem,
            vmem_limit_bytes=vmem_limit),
        cost_estimate=cost,
        input_output_aliases={1: 0},    # residual HBM buffer reused for the output
    )(x2, r2, wd_p, bd_p, wu_p, bu_p)

    if rows_p != rows or Hp != H:
        out = out[:rows, :H]
    return out.reshape(B, S, H)


adapter_forward_pallas = jax.jit(
    _adapter_forward,
    static_argnames=("tm", "tn", "allow_resident", "compute_dtype"))


# ------------------------- Controller-level glue -----------------------------
class Config:
    def __init__(self):
        self.tasks = ["VCR", "IQM"]
        self.use_fusion = False
        self.use_single_adapter = False
        self.hidden_size = 32
        self.reduction_factor = 2          # adapter bottleneck = hidden // 2
        self.non_linearity = "gelu"
        self.attention_probs_dropout_prob = 0.1


def init_adapter_params(key, hidden, down):
    """init_bert_weights-style init: N(0, 0.02) weights, zero biases."""
    k1, k2 = jax.random.split(key)
    return {
        "wd": 0.02 * jax.random.normal(k1, (hidden, down), dtype=jnp.float32),
        "bd": jnp.zeros((down,), jnp.float32),
        "wu": 0.02 * jax.random.normal(k2, (down, hidden), dtype=jnp.float32),
        "bu": jnp.zeros((hidden,), jnp.float32),
    }


def pack_adapter_params(p, compute_dtype=jnp.bfloat16):
    """Pre-pad to lane-dense 128-multiples and pre-cast weights to bf16 once at
    init, so the jitted forward never re-pads/re-casts the weights per call."""
    H, D = p["wd"].shape
    Hp, Dp = _ceil_to(H, 128), _ceil_to(D, 128)
    return {
        "wd": jnp.pad(p["wd"], ((0, Hp - H), (0, Dp - D))).astype(compute_dtype),
        "bd": jnp.pad(p["bd"], (0, Dp - D)).reshape(1, Dp).astype(jnp.float32),
        "wu": jnp.pad(p["wu"], ((0, Dp - D), (0, Hp - H))).astype(compute_dtype),
        "bu": jnp.pad(p["bu"], (0, Hp - H)).reshape(1, Hp).astype(jnp.float32),
    }


class AdapterControllerPallas:
    """JAX/Pallas port of AdapterController (non-fusion forward path)."""

    def __init__(self, config, key, place="upper"):
        self.config = config
        self.tasks = config.tasks
        self.use_fusion = config.use_fusion
        self.use_single_adapter = config.use_single_adapter
        down = config.hidden_size // config.reduction_factor
        self.adapters_raw = {}
        self.adapters = {}
        if self.use_single_adapter:
            raw = init_adapter_params(key, config.hidden_size, down)
            packed = pack_adapter_params(raw)
            for t in self.tasks:
                self.adapters_raw[t] = raw
                self.adapters[t] = packed
        else:
            keys = jax.random.split(key, len(self.tasks))
            for t, k in zip(self.tasks, keys):
                raw = init_adapter_params(k, config.hidden_size, down)
                self.adapters_raw[t] = raw
                self.adapters[t] = pack_adapter_params(raw)
        # TODO(synk): AdapterFusion module not provided; fusion path not fused.
        self.adapter_fusion_layer = None

    def forward(self, inp, input_tensor, task, **kwargs):
        # enable/disable_adapters are requires_grad toggles: no-op at inference.
        output = None
        for ttask in task:
            p = self.adapters[ttask]
            output = adapter_forward_pallas(
                inp, input_tensor, p["wd"], p["bd"], p["wu"], p["bu"], **kwargs)
            if not self.use_fusion or self.adapter_fusion_layer is None:
                return output
        # TODO(synk): fusion path (stack ups, permute, AdapterFusion attention).
        return output


# ---------------------------------- main -------------------------------------
if __name__ == "__main__":
    cfg = Config()
    B, S, H = 2, 8, cfg.hidden_size        # hidden=32, bottleneck=16

    key = jax.random.PRNGKey(0)
    k_params, k_x, k_res, k_extra = jax.random.split(key, 4)

    x = jax.random.normal(k_x, (B, S, H), dtype=jnp.float32)
    input_tensor = jax.random.normal(k_res, (B, S, H), dtype=jnp.float32)

    controller = AdapterControllerPallas(cfg, k_params)
    out = jax.block_until_ready(controller.forward(x, input_tensor, task=["VCR"]))

    def reference(xv, rv, p):
        # Same numerics recipe as the kernel: bf16 MXU operands, f32 accumulation,
        # f32 bias + gelu (tanh approx), bf16 gelu output feeding the up-proj.
        bf = lambda a: a.astype(jnp.bfloat16).astype(jnp.float32)
        h = jnp.einsum("bsh,hd->bsd", bf(xv), bf(p["wd"]),
                       precision=jax.lax.Precision.HIGHEST) + p["bd"]
        g = bf(jax.nn.gelu(h))
        up = jnp.einsum("bsd,dh->bsh", g, bf(p["wu"]),
                        precision=jax.lax.Precision.HIGHEST) + p["bu"]
        return up + rv

    ref = reference(x, input_tensor, controller.adapters_raw["VCR"])
    assert out.shape == (B, S, H)
    err = float(jnp.max(jnp.abs(out - ref)))
    assert jnp.allclose(out, ref, atol=2e-3, rtol=2e-3), err

    # Also exercise the hidden-tiled (non-resident) kernel variant: padded
    # hidden dim (160 -> 256), multiple row tiles and multiple hidden tiles.
    H2, D2, B2, S2 = 160, 80, 2, 24
    kp2, kx2, kr2 = jax.random.split(k_extra, 3)
    raw2 = init_adapter_params(kp2, H2, D2)
    packed2 = pack_adapter_params(raw2)
    x2 = jax.random.normal(kx2, (B2, S2, H2), dtype=jnp.float32)
    r2 = jax.random.normal(kr2, (B2, S2, H2), dtype=jnp.float32)
    out2 = jax.block_until_ready(adapter_forward_pallas(
        x2, r2, packed2["wd"], packed2["bd"], packed2["wu"], packed2["bu"],
        tm=16, tn=128, allow_resident=False))
    ref2 = reference(x2, r2, raw2)
    assert out2.shape == (B2, S2, H2)
    err2 = float(jnp.max(jnp.abs(out2 - ref2)))
    assert jnp.allclose(out2, ref2, atol=2e-3, rtol=2e-3), err2

    print("KERNEL_OK")
</pallas_src>

<mosaic_0001>
module attributes {stable_mosaic.version = 11 : i64} {
  func.func @_adapter_kernel_resident(%arg0: i32, %arg1: memref<16x128xf32, #tpu.memory_space<vmem>>, %arg2: memref<16x128xf32, #tpu.memory_space<vmem>>, %arg3: memref<128x128xbf16, #tpu.memory_space<vmem>>, %arg4: memref<1x128xf32, #tpu.memory_space<vmem>>, %arg5: memref<128x128xbf16, #tpu.memory_space<vmem>>, %arg6: memref<1x128xf32, #tpu.memory_space<vmem>>, %arg7: memref<16x128xf32, #tpu.memory_space<vmem>>) attributes {dimension_semantics = [#tpu.dimension_semantics<parallel>], iteration_bounds = array<i64: 1>, scalar_prefetch = 0 : i64, scratch_operands = 0 : i64, tpu.core_type = #tpu.core_type<tc>, window_params = [{transform_indices = @transform_0, window_bounds = array<i64: 16, 128>}, {transform_indices = @transform_1, window_bounds = array<i64: 16, 128>}, {pipeline_mode = #tpu.pipeline_mode<synchronous>, transform_indices = @transform_2, window_bounds = array<i64: 128, 128>}, {pipeline_mode = #tpu.pipeline_mode<synchronous>, transform_indices = @transform_3, window_bounds = array<i64: 1, 128>}, {pipeline_mode = #tpu.pipeline_mode<synchronous>, transform_indices = @transform_4, window_bounds = array<i64: 128, 128>}, {pipeline_mode = #tpu.pipeline_mode<synchronous>, transform_indices = @transform_5, window_bounds = array<i64: 1, 128>}, {transform_indices = @transform_6, window_bounds = array<i64: 16, 128>}]} {
    %c0 = arith.constant 0 : index
    %c0_0 = arith.constant 0 : index
    %0 = vector.load %arg1[%c0, %c0_0] : memref<16x128xf32, #tpu.memory_space<vmem>>, vector<16x128xf32>
    %1 = arith.truncf %0 : vector<16x128xf32> to vector<16x128xbf16>
    %c0_1 = arith.constant 0 : index
    %c0_2 = arith.constant 0 : index
    %2 = vector.load %arg3[%c0_1, %c0_2] : memref<128x128xbf16, #tpu.memory_space<vmem>>, vector<128x128xbf16>
    %cst = arith.constant dense<0.000000e+00> : vector<16x128xf32>
    %3 = tpu.matmul %1, %2, %cst {dimension_numbers = #tpu.dot_dimension_numbers<[1], [0], [0], [1], [0, 0, 1, 1], [], []>} : vector<16x128xbf16>, vector<128x128xbf16>, vector<16x128xf32> -> vector<16x128xf32>
    %c0_3 = arith.constant 0 : index
    %c0_4 = arith.constant 0 : index
    %4 = vector.load %arg4[%c0_3, %c0_4] : memref<1x128xf32, #tpu.memory_space<vmem>>, vector<1x128xf32>
    %5 = vector.broadcast %4 : vector<1x128xf32> to vector<16x128xf32>
    %6 = arith.addf %3, %5 : vector<16x128xf32>
    %7 = arith.mulf %6, %6 : vector<16x128xf32>
    %8 = arith.mulf %6, %7 : vector<16x128xf32>
    %cst_5 = arith.constant 4.471500e-02 : f32
    %9 = vector.broadcast %cst_5 : f32 to vector<16x128xf32>
    %10 = arith.mulf %9, %8 : vector<16x128xf32>
    %11 = arith.addf %6, %10 : vector<16x128xf32>
    %cst_6 = arith.constant 0.797884583 : f32
    %12 = vector.broadcast %cst_6 : f32 to vector<16x128xf32>
    %13 = arith.mulf %12, %11 : vector<16x128xf32>
    %14 = math.tanh %13 : vector<16x128xf32>
    %cst_7 = arith.constant 1.000000e+00 : f32
    %15 = vector.broadcast %cst_7 : f32 to vector<16x128xf32>
    %16 = arith.addf %15, %14 : vector<16x128xf32>
    %cst_8 = arith.constant 5.000000e-01 : f32
    %17 = vector.broadcast %cst_8 : f32 to vector<16x128xf32>
    %18 = arith.mulf %17, %16 : vector<16x128xf32>
    %19 = arith.mulf %6, %18 : vector<16x128xf32>
    %20 = arith.truncf %19 : vector<16x128xf32> to vector<16x128xbf16>
    %c0_9 = arith.constant 0 : index
    %c0_10 = arith.constant 0 : index
    %21 = vector.load %arg5[%c0_9, %c0_10] : memref<128x128xbf16, #tpu.memory_space<vmem>>, vector<128x128xbf16>
    %cst_11 = arith.constant dense<0.000000e+00> : vector<16x128xf32>
    %22 = tpu.matmul %20, %21, %cst_11 {dimension_numbers = #tpu.dot_dimension_numbers<[1], [0], [0], [1], [0, 0, 1, 1], [], []>} : vector<16x128xbf16>, vector<128x128xbf16>, vector<16x128xf32> -> vector<16x128xf32>
    %c0_12 = arith.constant 0 : index
    %c0_13 = arith.constant 0 : index
    %23 = vector.load %arg6[%c0_12, %c0_13] : memref<1x128xf32, #tpu.memory_space<vmem>>, vector<1x128xf32>
    %24 = vector.broadcast %23 : vector<1x128xf32> to vector<16x128xf32>
    %25 = arith.addf %22, %24 : vector<16x128xf32>
    %c0_14 = arith.constant 0 : index
    %c0_15 = arith.constant 0 : index
    %26 = vector.load %arg2[%c0_14, %c0_15] : memref<16x128xf32, #tpu.memory_space<vmem>>, vector<16x128xf32>
    %27 = arith.addf %25, %26 : vector<16x128xf32>
    %c0_16 = arith.constant 0 : index
    %c0_17 = arith.constant 0 : index
    %28 = vector.load %arg7[%c0_16, %c0_17] : memref<16x128xf32, #tpu.memory_space<vmem>>, vector<16x128xf32>
    tpu.vector_store %arg7[%c0_16, %c0_17], %27 {strides = array<i32>} : memref<16x128xf32, #tpu.memory_space<vmem>>, vector<16x128xf32>,
    return
  }
  func.func @transform_0(%arg0: i32) -> (i32, i32) {
    %c0_i32 = arith.constant 0 : i32
    %c0_i32_0 = arith.constant 0 : i32
    return %arg0, %c0_i32 : i32, i32
  }
  func.func @transform_1(%arg0: i32) -> (i32, i32) {
    %c0_i32 = arith.constant 0 : i32
    %c0_i32_0 = arith.constant 0 : i32
    return %arg0, %c0_i32 : i32, i32
  }
  func.func @transform_2(%arg0: i32) -> (i32, i32) {
    %c0_i32 = arith.constant 0 : i32
    %c0_i32_0 = arith.constant 0 : i32
    %c0_i32_1 = arith.constant 0 : i32
    return %c0_i32, %c0_i32_0 : i32, i32
  }
  func.func @transform_3(%arg0: i32) -> (i32, i32) {
    %c0_i32 = arith.constant 0 : i32
    %c0_i32_0 = arith.constant 0 : i32
    %c0_i32_1 = arith.constant 0 : i32
    return %c0_i32, %c0_i32_0 : i32, i32
  }
  func.func @transform_4(%arg0: i32) -> (i32, i32) {
    %c0_i32 = arith.constant 0 : i32
    %c0_i32_0 = arith.constant 0 : i32
    %c0_i32_1 = arith.constant 0 : i32
    return %c0_i32, %c0_i32_0 : i32, i32
  }
  func.func @transform_5(%arg0: i32) -> (i32, i32) {
    %c0_i32 = arith.constant 0 : i32
    %c0_i32_0 = arith.constant 0 : i32
    %c0_i32_1 = arith.constant 0 : i32
    return %c0_i32, %c0_i32_0 : i32, i32
  }
  func.func @transform_6(%arg0: i32) -> (i32, i32) {
    %c0_i32 = arith.constant 0 : i32
    %c0_i32_0 = arith.constant 0 : i32
    return %arg0, %c0_i32 : i32, i32
  }
}

</mosaic_0001>

<bundles_post_ra>
// kernel: _adapter_forward.1
= control target key start
LH: loop header
LB: loop body
LE: loop exit
PB: predicated region body
PF: predicated region fallthrough
CT: control target
= control target key end

     0   :  { %11 = vsyncpa [#allocation3], 0  ;;  %s420_s21 = smov [#allocation2]   ;;  %s520_s0 = inlined_call_operand.vmem [shape: f32[16,128], index: 0, kind: input, shape index: {}]   ;;  %s521_s1 = inlined_call_operand.vmem [shape: f32[16,128], index: 1, kind: input, shape index: {}, may-alias: {1,6}]   ;;  %s522_s2 = inlined_call_operand.vmem [shape: bf16[128,128], index: 2, kind: input, shape index: {}]   ;;  %s523_s3 = inlined_call_operand.vmem [shape: f32[1,128], index: 3, kind: input, shape index: {}]   ;;  %s524_s4 = inlined_call_operand.hbm [shape: bf16[128,128], index: 4, kind: input, shape index: {}]   ;;  %s525_s5 = inlined_call_operand.vmem [shape: f32[1,128], index: 5, kind: input, shape index: {}]   ;;  %s526_s6 = inlined_call_operand.vmem [shape: f32[16,128], index: 6, kind: output, shape index: {}, may-alias: {1,6}]  }
   0x1   :  { %s25_s22 = sshll.u32 %s420_s21, 4  ;;  %s396_s25 = scalar_lea.hbm %s524_s4, 1024  ;;  %s26_s22 = int_to_ptr.vmem [resolvable:$true] %s25_s22 }
   0x2   :  { %p397_p0 = scmp.ne.s32.totalorder %s524_s4, %s396_s25  ;;  %p400_p1 = scmp.lt.u32.totalorder %s396_s25, %s524_s4 }
   0x4   :  { %p402_p2 = pnand %p400_p1, %p397_p0 }
   0x6   :  { %405 = shalt.err (!%p402_p2)
}
   0x7   :  { %s406_s30 = scalar_lea.vmem %s26_s22, 1024  ;;  %p411_p4 = scmp.lt.s32.totalorder %s26_s22, %s26_s22 }
   0x8   :  { %p407_p3 = scmp.ne.s32.totalorder %s26_s22, %s406_s30  ;;  %p412_p5 = scmp.lt.s32.totalorder %s406_s30, %s406_s30 }
   0xa   :  { %p413_p6 = por %p412_p5, %p411_p4 }
   0xc   :  { %p414_p7 = pnand %p413_p6, %p407_p3 }
   0xe   :  { %417 = shalt.err (!%p414_p7)
}
   0xf   :  { %s421_s7 = smov 64   ;;  %s422_s8 = smov 4  }
  0x10   :  { %31 = dma.hbm_to_vmem [thread:$0]  %s524_s4, 1024, %s26_s22, [#allocation3], %s421_s7, %s421_s7, %s422_s8  }
  0x11   :  { %418 = dma.done.wait [#allocation3], 1024  }
  0x12   :  { %419 = vsyncadd [#allocation3], 4294966272  ;;  %v423_v0 = vmov 0.0   ;;  %vm424_vm0 = vmmov 0   ;;  %v376_v1 = vld [vmem:[%s522_s2] sm:$0xff]   ;;  %v377_v2 = vld [vmem:[%s522_s2 + $0x8] sm:$0xff]  }
  0x13   :  { %331 = vmatprep.subr.bf16.mxu0 %v423_v0  ;;  %347 = vmatprep.mubr.msk.bf16.mxu0 %vm424_vm0, %v423_v0  ;;  %v378_v3 = vld [vmem:[%s522_s2 + $0x10] sm:$0xff]   ;;  %v379_v4 = vld [vmem:[%s522_s2 + $0x18] sm:$0xff]   ;;  %v380_v5 = vld [vmem:[%s522_s2 + $0x20] sm:$0xff]  }
  0x14   :  { %351 = vmatprep.subr.bf16.mxu1 %v423_v0  ;;  %367 = vmatprep.mubr.msk.bf16.mxu1 %vm424_vm0, %v423_v0  ;;  %v381_v6 = vld [vmem:[%s522_s2 + $0x28] sm:$0xff]   ;;  %v382_v7 = vld [vmem:[%s522_s2 + $0x30] sm:$0xff]   ;;  %v383_v8 = vld [vmem:[%s522_s2 + $0x38] sm:$0xff]  }
  0x15   :  { %332 = vmatpush3.bf16.msra.mxu0 %v376_v1  ;;  %v38_v9 = vld [vmem:[%s520_s0] sm:$0xff]  ;;  %v39_v10 = vld [vmem:[%s520_s0 + $0x8] sm:$0xff]  ;;  %v386_v14 = vld [vmem:[#allocation2 + $0x10] sm:$0xff]  }
  0x16   :  { %333 = vmatprep.subr.bf16.mxu0 %v423_v0  ;;  %v40_v11 = vpack.c.bf16 %v39_v10, %v38_v9  ;;  %v384_v12 = vld [vmem:[#allocation2] sm:$0xff]   ;;  %v385_v13 = vld [vmem:[#allocation2 + $0x8] sm:$0xff]   ;;  %v387_v15 = vld [vmem:[#allocation2 + $0x18] sm:$0xff]  }
  0x17   :  { %352 = vmatpush3.bf16.msra.mxu1 %v384_v12  ;;  %v388_v16 = vld [vmem:[#allocation2 + $0x20] sm:$0xff]   ;;  %v389_v17 = vld [vmem:[#allocation2 + $0x28] sm:$0xff]   ;;  %v390_v18 = vld [vmem:[#allocation2 + $0x30] sm:$0xff]  }
  0x18   :  { %353 = vmatprep.subr.bf16.mxu1 %v423_v0  ;;  %v391_v19 = vld [vmem:[#allocation2 + $0x38] sm:$0xff]   ;;  %v295_v20 = vld [vmem:[%s523_s3] ss:$0 sm:$0xff]  ;;  %v285_v52 = vld [vmem:[%s521_s1 + $0x8] sm:$0xff] }
  0x19   :  { %334 = vmatpush3.bf16.msra.mxu0 %v377_v2  ;;  %v304_v46 = vld [vmem:[%s525_s5] ss:$0 sm:$0xff] }
  0x1a   :  { %335 = vmatprep.subr.bf16.mxu0 %v423_v0  ;;  %v284_v48 = vld [vmem:[%s521_s1] sm:$0xff] }
  0x1b   :  { %354 = vmatpush3.bf16.msra.mxu1 %v385_v13 }
  0x1c   :  { %355 = vmatprep.subr.bf16.mxu1 %v423_v0 }
  0x1d   :  { %336 = vmatpush3.bf16.msra.mxu0 %v378_v3 }
  0x1e   :  { %337 = vmatprep.subr.bf16.mxu0 %v423_v0 }
  0x1f   :  { %356 = vmatpush3.bf16.msra.mxu1 %v386_v14 }
  0x20   :  { %357 = vmatprep.subr.bf16.mxu1 %v423_v0 }
  0x21   :  { %338 = vmatpush3.bf16.msra.mxu0 %v379_v4 }
  0x22   :  { %339 = vmatprep.subr.bf16.mxu0 %v423_v0 }
  0x23   :  { %358 = vmatpush3.bf16.msra.mxu1 %v387_v15 }
  0x24   :  { %359 = vmatprep.subr.bf16.mxu1 %v423_v0 }
  0x25   :  { %340 = vmatpush3.bf16.msra.mxu0 %v380_v5 }
  0x26   :  { %341 = vmatprep.subr.bf16.mxu0 %v423_v0 }
  0x27   :  { %360 = vmatpush3.bf16.msra.mxu1 %v388_v16 }
  0x28   :  { %361 = vmatprep.subr.bf16.mxu1 %v423_v0 }
  0x29   :  { %342 = vmatpush3.bf16.msra.mxu0 %v381_v6 }
  0x2a   :  { %343 = vmatprep.subr.bf16.mxu0 %v423_v0 }
  0x2b   :  { %362 = vmatpush3.bf16.msra.mxu1 %v389_v17 }
  0x2c   :  { %363 = vmatprep.subr.bf16.mxu1 %v423_v0 }
  0x2d   :  { %344 = vmatpush3.bf16.msra.mxu0 %v382_v7 }
  0x2e   :  { %345 = vmatprep.subr.bf16.mxu0 %v423_v0 }
  0x2f   :  { %364 = vmatpush3.bf16.msra.mxu1 %v390_v18 }
  0x30   :  { %365 = vmatprep.subr.bf16.mxu1 %v423_v0 }
  0x31   :  { %346 = vmatpush3.bf16.msra.mxu0 %v383_v8 }
  0x33   :  { %366 = vmatpush3.bf16.msra.mxu1 %v391_v19 }
  0x34   :  { %348 = vmatmul.mubr.bf16.vlgmr.msra.gmra.mrb[0].mxu0 %v40_v11 }
 0x107   :  { %v146_v21 = vpop.f32.mrb[0].mxu0 }
 0x108   :  { %v147_v22 = vadd.f32 %v295_v20, %v146_v21  ;;  %v349_v23 = vpop.f32.mrb[1].mxu0 }
 0x109   :  { %v149_v24 = vpop.f32.mrb[2].mxu0 }
 0x10a   :  { %v153_v25 = vmul.f32 %v147_v22, %v147_v22  ;;  %v150_v26 = vadd.f32 %v295_v20, %v149_v24  ;;  %v350_v27 = vpop.f32.mrb[3].mxu0 }
 0x10c   :  { %v155_v28 = vmul.f32 %v153_v25, %v147_v22  ;;  %v154_v29 = vmul.f32 %v150_v26, %v150_v26 }
 0x10e   :  { %v157_v30 = vmul.f32 0.044715, %v155_v28  ;;  %v156_v31 = vmul.f32 %v154_v29, %v150_v26 }
 0x110   :  { %v159_v32 = vadd.f32 %v157_v30, %v147_v22  ;;  %v158_v33 = vmul.f32 0.044715, %v156_v31 }
 0x112   :  { %v161_v34 = vmul.f32 0.7978846, %v159_v32  ;;  %v160_v35 = vadd.f32 %v158_v33, %v150_v26 }
 0x114   :  { %392 = vtanh.f32 %v161_v34  ;;  %v162_v36 = vmul.f32 0.7978846, %v160_v35 }
 0x116   :  { %394 = vtanh.f32 %v162_v36 }
 0x11e   :  { %v393_v37 = vpop.eup %392 }
 0x11f   :  { %v165_v38 = vadd.f32 1.0, %v393_v37 }
 0x120   :  { %v395_v39 = vpop.eup %394 }
 0x121   :  { %v166_v40 = vadd.f32 1.0, %v395_v39  ;;  %v167_v41 = vmul.f32 0.5, %v165_v38 }
 0x123   :  { %v168_v42 = vmul.f32 0.5, %v166_v40  ;;  %v169_v43 = vmul.f32 %v167_v41, %v147_v22 }
 0x125   :  { %v170_v44 = vmul.f32 %v168_v42, %v150_v26 }
 0x127   :  { %v171_v45 = vpack.c.bf16 %v170_v44, %v169_v43 }
 0x129   :  { %368 = vmatmul.mubr.bf16.vlgmr.msra.gmra.mrb[0].mxu1 %v171_v45 }
 0x1fc   :  { %v277_v47 = vpop.f32.mrb[0].mxu1 }
 0x1fd   :  { %v278_v49 = vadd.f32 %v304_v46, %v277_v47  ;;  %v369_v50 = vpop.f32.mrb[1].mxu1 }
 0x1fe   :  { %v280_v51 = vpop.f32.mrb[2].mxu1 }
 0x1ff   :  { %v286_v53 = vadd.f32 %v284_v48, %v278_v49  ;;  %v281_v54 = vadd.f32 %v304_v46, %v280_v51  ;;  %v370_v55 = vpop.f32.mrb[3].mxu1 }
 0x201   :  { %288 = vst [vmem:[%s526_s6] sm:$0xff] %v286_v53  ;;  %v287_v56 = vadd.f32 %v285_v52, %v281_v54 }
 0x203   :  { %289 = vst [vmem:[%s526_s6 + $0x8] sm:$0xff] %v287_v56 }
 0x204   :  { %294 = vsyncpa [#allocation3], 1 }

</bundles_post_ra>
